<compile_context>
chip_gen: v7x
topology: tpu7x:2x2x1
jax: 0.10.0
libtpu: 0.0.40
codegen_flags: <defaults>
</compile_context>

<pallas_src>
import jax
import jax.numpy as jnp
from jax.experimental import pallas as pl
from jax.experimental.pallas import tpu as pltpu

HIDDEN = 768      # backbone output width consumed by fc1
FC1 = 256
FC2 = 14          # 14 torsion-angle outputs
FC2_PAD = 128     # lane-dense padded output width
TM_MAX = 2048     # token-tile rows (f32 x double-buffered ~12 MiB, safe on all gens)


def _round_up(n, m):
    return (n + m - 1) // m * m


def _pick_tm(M):
    """Token-tile rows: multiple of 16 (bf16 packing), <= TM_MAX, and on large M
    aim for >= 4 grid steps so both v7x TensorCores stay busy."""
    m16 = _round_up(M, 16)
    if m16 <= 512:
        return m16
    tm = _round_up(pl.cdiv(M, 4), 512)
    return max(512, min(TM_MAX, tm, m16))


def head_kernel(x_ref, w1_ref, b1_ref, w2_ref, b2_ref, o_ref):
    # x_ref : [TM, 768] f32 (cast to bf16 in-kernel; VPU, free)
    # w1_ref: [768, 256] bf16       b1_ref: [1, 256] f32
    # w2_ref: [256, 128] bf16 (cols 14..127 zero)   b2_ref: [1, 128] f32
    # o_ref : [TM, 128] bf16 (lane-dense; caller slices :14 and upcasts)
    x = x_ref[...].astype(jnp.bfloat16)
    h = jnp.dot(x, w1_ref[...], preferred_element_type=jnp.float32)
    h = jnp.maximum(h + b1_ref[...], 0.0)                         # bias + ReLU (VPU)
    o = jnp.dot(h.astype(jnp.bfloat16), w2_ref[...],
                preferred_element_type=jnp.float32) + b2_ref[...]  # bf16 MXU, f32 acc
    o_ref[...] = jnp.tanh(o).astype(o_ref.dtype)                   # tanh (EUP), bf16 store


def finetune_angle_head(hidden_states, w1, b1, w2, b2):
    """hidden_states: [B, S, 768] (backbone 'logits', any float dtype).
    Returns [B, S-2, 14] float32, matching the PyTorch forward semantics."""
    B, S, D = hidden_states.shape
    assert D == HIDDEN
    M = B * S

    # Free reshape only — no wrapper-side dtype cast of the 768-wide tensor.
    x = hidden_states.reshape(M, D)
    w1b = w1.astype(jnp.bfloat16)
    b1r = b1.reshape(1, FC1).astype(jnp.float32)
    # Zero-pad fc2 to 128 output lanes; ship it in bf16 for a full-rate MXU pass.
    w2p = jnp.zeros((FC1, FC2_PAD), jnp.bfloat16).at[:, :FC2].set(w2.astype(jnp.bfloat16))
    b2p = jnp.zeros((1, FC2_PAD), jnp.float32).at[:, :FC2].set(b2.reshape(FC2).astype(jnp.float32))

    tm = _pick_tm(M)
    grid = (pl.cdiv(M, tm),)

    x_bytes = M * D * x.dtype.itemsize
    w_bytes = D * FC1 * 2 + FC1 * FC2_PAD * 2 + (FC1 + FC2_PAD) * 4
    out_bytes = M * FC2_PAD * 2
    cost = pl.CostEstimate(
        flops=2 * M * (D * FC1 + FC1 * FC2_PAD),
        transcendentals=M * FC2_PAD,
        bytes_accessed=x_bytes + w_bytes + out_bytes,
    )

    out = pl.pallas_call(
        head_kernel,
        out_shape=jax.ShapeDtypeStruct((M, FC2_PAD), jnp.bfloat16),
        grid_spec=pltpu.PrefetchScalarGridSpec(
            num_scalar_prefetch=0,
            grid=grid,
            in_specs=[
                pl.BlockSpec((tm, D), lambda i: (i, 0)),          # x tile (pipelined)
                pl.BlockSpec((D, FC1), lambda i: (0, 0)),         # w1 (resident)
                pl.BlockSpec((1, FC1), lambda i: (0, 0)),         # b1 (resident)
                pl.BlockSpec((FC1, FC2_PAD), lambda i: (0, 0)),   # w2 padded (resident)
                pl.BlockSpec((1, FC2_PAD), lambda i: (0, 0)),     # b2 padded (resident)
            ],
            out_specs=pl.BlockSpec((tm, FC2_PAD), lambda i: (i, 0)),
        ),
        compiler_params=pltpu.CompilerParams(
            dimension_semantics=("parallel",),        # 2 TCs on v7x split the token grid
            vmem_limit_bytes=32 * 1024 * 1024,        # headroom for TM=2048 f32 x tiles
        ),
        cost_estimate=cost,
    )(x, w1b, b1r, w2p, b2p)

    # Cheap glue on the narrow output only: drop special tokens, padded lanes, upcast.
    return out.reshape(B, S, FC2_PAD)[:, 1:-1, :FC2].astype(jnp.float32)


def forward(input_ids, attention_masks, params):
    """Full FineTuneAngle.forward with a deterministic stand-in backbone."""
    emb, w1, b1, w2, b2 = params
    # TODO(synk): stand-in for the pretrained birnabert backbone.
    hidden = emb[input_ids] * attention_masks[..., None].astype(jnp.float32)
    return finetune_angle_head(hidden, w1, b1, w2, b2)


if __name__ == "__main__":
    key = jax.random.PRNGKey(0)
    k_emb, k_w1, k_b1, k_w2, k_b2, k_ids = jax.random.split(key, 6)

    B, S = 2, 8            # small batch / sequence
    VOCAB = 32             # stand-in vocab for the synthetic backbone

    emb = jax.random.normal(k_emb, (VOCAB, HIDDEN), jnp.float32)
    w1  = jax.random.normal(k_w1, (HIDDEN, FC1), jnp.float32) * (1.0 / HIDDEN) ** 0.5
    b1  = jax.random.normal(k_b1, (FC1,), jnp.float32) * 0.01
    w2  = jax.random.normal(k_w2, (FC1, FC2), jnp.float32) * (1.0 / FC1) ** 0.5
    b2  = jax.random.normal(k_b2, (FC2,), jnp.float32) * 0.01
    params = (emb, w1, b1, w2, b2)

    input_ids = jax.random.randint(k_ids, (B, S), 0, VOCAB, dtype=jnp.int32)
    attention_masks = jnp.ones((B, S), dtype=jnp.int32)

    fwd = jax.jit(forward)   # lets the backbone fuse with the kernel's producer side
    out = jax.block_until_ready(fwd(input_ids, attention_masks, params))
    assert out.shape == (B, S - 2, FC2), out.shape
    assert out.dtype == jnp.float32

    # Pure-JAX reference of the head (bf16 matmuls, f32 accumulation, like the kernel).
    hidden = emb[input_ids] * attention_masks[..., None].astype(jnp.float32)
    xb = hidden.reshape(-1, HIDDEN).astype(jnp.bfloat16)
    h = jnp.dot(xb, w1.astype(jnp.bfloat16), preferred_element_type=jnp.float32) + b1
    h = jnp.maximum(h, 0.0)
    o = jnp.tanh(jnp.dot(h.astype(jnp.bfloat16), w2.astype(jnp.bfloat16),
                         preferred_element_type=jnp.float32) + b2)
    ref = o.reshape(B, S, FC2)[:, 1:-1, :]

    err = jnp.max(jnp.abs(out - ref))
    assert jnp.allclose(out, ref, atol=2e-2, rtol=2e-2), float(err)

    print("KERNEL_OK")
</pallas_src>

<mosaic_0001>
module attributes {stable_mosaic.version = 11 : i64} {
  func.func @head_kernel(%arg0: i32, %arg1: memref<16x768xf32, #tpu.memory_space<vmem>>, %arg2: memref<768x256xbf16, #tpu.memory_space<vmem>>, %arg3: memref<1x256xf32, #tpu.memory_space<vmem>>, %arg4: memref<256x128xbf16, #tpu.memory_space<vmem>>, %arg5: memref<1x128xf32, #tpu.memory_space<vmem>>, %arg6: memref<16x128xbf16, #tpu.memory_space<vmem>>) attributes {dimension_semantics = [#tpu.dimension_semantics<parallel>], iteration_bounds = array<i64: 1>, scalar_prefetch = 0 : i64, scratch_operands = 0 : i64, tpu.core_type = #tpu.core_type<tc>, window_params = [{transform_indices = @transform_0, window_bounds = array<i64: 16, 768>}, {pipeline_mode = #tpu.pipeline_mode<synchronous>, transform_indices = @transform_1, window_bounds = array<i64: 768, 256>}, {pipeline_mode = #tpu.pipeline_mode<synchronous>, transform_indices = @transform_2, window_bounds = array<i64: 1, 256>}, {pipeline_mode = #tpu.pipeline_mode<synchronous>, transform_indices = @transform_3, window_bounds = array<i64: 256, 128>}, {pipeline_mode = #tpu.pipeline_mode<synchronous>, transform_indices = @transform_4, window_bounds = array<i64: 1, 128>}, {transform_indices = @transform_5, window_bounds = array<i64: 16, 128>}]} {
    %c0 = arith.constant 0 : index
    %c0_0 = arith.constant 0 : index
    %0 = vector.load %arg1[%c0, %c0_0] : memref<16x768xf32, #tpu.memory_space<vmem>>, vector<16x768xf32>
    %1 = arith.truncf %0 : vector<16x768xf32> to vector<16x768xbf16>
    %c0_1 = arith.constant 0 : index
    %c0_2 = arith.constant 0 : index
    %2 = vector.load %arg2[%c0_1, %c0_2] : memref<768x256xbf16, #tpu.memory_space<vmem>>, vector<768x256xbf16>
    %cst = arith.constant dense<0.000000e+00> : vector<16x256xf32>
    %3 = tpu.matmul %1, %2, %cst {dimension_numbers = #tpu.dot_dimension_numbers<[1], [0], [0], [1], [0, 0, 1, 1], [], []>} : vector<16x768xbf16>, vector<768x256xbf16>, vector<16x256xf32> -> vector<16x256xf32>
    %c0_3 = arith.constant 0 : index
    %c0_4 = arith.constant 0 : index
    %4 = vector.load %arg3[%c0_3, %c0_4] : memref<1x256xf32, #tpu.memory_space<vmem>>, vector<1x256xf32>
    %5 = vector.broadcast %4 : vector<1x256xf32> to vector<16x256xf32>
    %6 = arith.addf %3, %5 : vector<16x256xf32>
    %cst_5 = arith.constant 0.000000e+00 : f32
    %7 = vector.broadcast %cst_5 : f32 to vector<16x256xf32>
    %8 = arith.maximumf %6, %7 : vector<16x256xf32>
    %9 = arith.truncf %8 : vector<16x256xf32> to vector<16x256xbf16>
    %c0_6 = arith.constant 0 : index
    %c0_7 = arith.constant 0 : index
    %10 = vector.load %arg4[%c0_6, %c0_7] : memref<256x128xbf16, #tpu.memory_space<vmem>>, vector<256x128xbf16>
    %cst_8 = arith.constant dense<0.000000e+00> : vector<16x128xf32>
    %11 = tpu.matmul %9, %10, %cst_8 {dimension_numbers = #tpu.dot_dimension_numbers<[1], [0], [0], [1], [0, 0, 1, 1], [], []>} : vector<16x256xbf16>, vector<256x128xbf16>, vector<16x128xf32> -> vector<16x128xf32>
    %c0_9 = arith.constant 0 : index
    %c0_10 = arith.constant 0 : index
    %12 = vector.load %arg5[%c0_9, %c0_10] : memref<1x128xf32, #tpu.memory_space<vmem>>, vector<1x128xf32>
    %13 = vector.broadcast %12 : vector<1x128xf32> to vector<16x128xf32>
    %14 = arith.addf %11, %13 : vector<16x128xf32>
    %15 = math.tanh %14 : vector<16x128xf32>
    %16 = arith.truncf %15 : vector<16x128xf32> to vector<16x128xbf16>
    %c0_11 = arith.constant 0 : index
    %c0_12 = arith.constant 0 : index
    %17 = vector.load %arg6[%c0_11, %c0_12] : memref<16x128xbf16, #tpu.memory_space<vmem>>, vector<16x128xbf16>
    tpu.vector_store %arg6[%c0_11, %c0_12], %16 {strides = array<i32>} : memref<16x128xbf16, #tpu.memory_space<vmem>>, vector<16x128xbf16>,
    return
  }
  func.func @transform_0(%arg0: i32) -> (i32, i32) {
    %c0_i32 = arith.constant 0 : i32
    %c0_i32_0 = arith.constant 0 : i32
    return %arg0, %c0_i32 : i32, i32
  }
  func.func @transform_1(%arg0: i32) -> (i32, i32) {
    %c0_i32 = arith.constant 0 : i32
    %c0_i32_0 = arith.constant 0 : i32
    %c0_i32_1 = arith.constant 0 : i32
    return %c0_i32, %c0_i32_0 : i32, i32
  }
  func.func @transform_2(%arg0: i32) -> (i32, i32) {
    %c0_i32 = arith.constant 0 : i32
    %c0_i32_0 = arith.constant 0 : i32
    %c0_i32_1 = arith.constant 0 : i32
    return %c0_i32, %c0_i32_0 : i32, i32
  }
  func.func @transform_3(%arg0: i32) -> (i32, i32) {
    %c0_i32 = arith.constant 0 : i32
    %c0_i32_0 = arith.constant 0 : i32
    %c0_i32_1 = arith.constant 0 : i32
    return %c0_i32, %c0_i32_0 : i32, i32
  }
  func.func @transform_4(%arg0: i32) -> (i32, i32) {
    %c0_i32 = arith.constant 0 : i32
    %c0_i32_0 = arith.constant 0 : i32
    %c0_i32_1 = arith.constant 0 : i32
    return %c0_i32, %c0_i32_0 : i32, i32
  }
  func.func @transform_5(%arg0: i32) -> (i32, i32) {
    %c0_i32 = arith.constant 0 : i32
    %c0_i32_0 = arith.constant 0 : i32
    return %arg0, %c0_i32 : i32, i32
  }
}

</mosaic_0001>

<bundles_post_ra>
// kernel: forward.1
= control target key start
LH: loop header
LB: loop body
LE: loop exit
PB: predicated region body
PF: predicated region fallthrough
CT: control target
= control target key end

     0   :  { %s1685_s1 = inlined_call_operand.vmem [shape: bf16[768,256], index: 1, kind: input, shape index: {}]   ;;  %s1686_s0 = inlined_call_operand.vmem [shape: f32[16,768], index: 0, kind: input, shape index: {}]   ;;  %s1687_s3 = inlined_call_operand.vmem [shape: bf16[256,128], index: 3, kind: input, shape index: {}]   ;;  %s1688_s2 = inlined_call_operand.vmem [shape: f32[1,256], index: 2, kind: input, shape index: {}]   ;;  %s1689_s4 = inlined_call_operand.vmem [shape: f32[1,128], index: 4, kind: input, shape index: {}]   ;;  %s1690_s5 = inlined_call_operand.vmem [shape: bf16[16,128], index: 5, kind: output, shape index: {}]  }
   0x1   :  { %v1110_v0 = vld [vmem:[%s1685_s1 + $0x104] ss:$8 sps:$4 sm:$0xff]   ;;  %v1112_v1 = vld [vmem:[%s1685_s1 + $0x100] ss:$8 sps:$4 sm:$0xff]   ;;  %v1113_v2 = vld [vmem:[%s1685_s1 + $0x114] ss:$8 sps:$4 sm:$0xff]  }
   0x2   :  { %670 = vmatprep.subr.bf16.mxu0 %v1110_v0  ;;  %v1115_v3 = vld [vmem:[%s1685_s1 + $0x110] ss:$8 sps:$4 sm:$0xff]   ;;  %v1116_v4 = vld [vmem:[%s1685_s1 + $0x124] ss:$8 sps:$4 sm:$0xff]   ;;  %v1118_v5 = vld [vmem:[%s1685_s1 + $0x120] ss:$8 sps:$4 sm:$0xff]  }
   0x3   :  { %671 = vmatpush1.bf16.msra.mxu0 %v1112_v1  ;;  %v1119_v6 = vld [vmem:[%s1685_s1 + $0x134] ss:$8 sps:$4 sm:$0xff]   ;;  %v1121_v7 = vld [vmem:[%s1685_s1 + $0x130] ss:$8 sps:$4 sm:$0xff]   ;;  %v1122_v8 = vld [vmem:[%s1685_s1 + $0x144] ss:$8 sps:$4 sm:$0xff]  }
   0x4   :  { %672 = vmatprep.subr.bf16.mxu0 %v1113_v2  ;;  %v1124_v9 = vld [vmem:[%s1685_s1 + $0x140] ss:$8 sps:$4 sm:$0xff]   ;;  %v1125_v10 = vld [vmem:[%s1685_s1 + $0x154] ss:$8 sps:$4 sm:$0xff]   ;;  %v1127_v11 = vld [vmem:[%s1685_s1 + $0x150] ss:$8 sps:$4 sm:$0xff]  }
   0x5   :  { %v1128_v12 = vld [vmem:[%s1685_s1 + $0x164] ss:$8 sps:$4 sm:$0xff]   ;;  %v1157_v14 = vld [vmem:[%s1685_s1] ss:$8 sps:$4 sm:$0xff]   ;;  %v1131_v16 = vld [vmem:[%s1685_s1 + $0x174] ss:$8 sps:$4 sm:$0xff]  }
   0x6   :  { %v1155_v13 = vld [vmem:[%s1685_s1 + $0x4] ss:$8 sps:$4 sm:$0xff]   ;;  %v1130_v15 = vld [vmem:[%s1685_s1 + $0x160] ss:$8 sps:$4 sm:$0xff]   ;;  %v1161_v17 = vld [vmem:[%s1685_s1 + $0x14] ss:$8 sps:$4 sm:$0xff]  }
   0x7   :  { %673 = vmatpush1.bf16.msra.mxu0 %v1115_v3  ;;  %627 = vmatprep.subr.bf16.mxu1 %v1155_v13  ;;  %v1163_v18 = vld [vmem:[%s1685_s1 + $0x10] ss:$8 sps:$4 sm:$0xff]   ;;  %v30_v20 = vld [vmem:[%s1686_s0 + $0x48] sm:$0xff]  ;;  %v1173_v27 = vld [vmem:[%s1685_s1 + $0x34] ss:$8 sps:$4 sm:$0xff]  }
   0x8   :  { %674 = vmatprep.subr.bf16.mxu0 %v1116_v4  ;;  %628 = vmatpush1.bf16.msra.mxu1 %v1157_v14  ;;  %v24_v19 = vld [vmem:[%s1686_s0 + $0x18] sm:$0xff]  ;;  %v1167_v23 = vld [vmem:[%s1685_s1 + $0x24] ss:$8 sps:$4 sm:$0xff]   ;;  %v1169_v24 = vld [vmem:[%s1685_s1 + $0x20] ss:$8 sps:$4 sm:$0xff]  }
   0x9   :  { %629 = vmatprep.subr.bf16.mxu1 %v1161_v17  ;;  %v36_v21 = vpack.c.bf16 %v30_v20, %v24_v19  ;;  %v1133_v22 = vld [vmem:[%s1685_s1 + $0x170] ss:$8 sps:$4 sm:$0xff]   ;;  %v1134_v25 = vld [vmem:[%s1685_s1 + $0x184] ss:$8 sps:$4 sm:$0xff]   ;;  %v1136_v26 = vld [vmem:[%s1685_s1 + $0x180] ss:$8 sps:$4 sm:$0xff]  }
   0xa   :  { %v1137_v28 = vld [vmem:[%s1685_s1 + $0x194] ss:$8 sps:$4 sm:$0xff]   ;;  %v1175_v29 = vld [vmem:[%s1685_s1 + $0x30] ss:$8 sps:$4 sm:$0xff]   ;;  %v1179_v30 = vld [vmem:[%s1685_s1 + $0x44] ss:$8 sps:$4 sm:$0xff]  }
   0xb   :  { %675 = vmatpush1.bf16.msra.mxu0 %v1118_v5  ;;  %702 = vmatprep.mubr.bf16.mxu0 %v36_v21  ;;  %v1139_v31 = vld [vmem:[%s1685_s1 + $0x190] ss:$8 sps:$4 sm:$0xff]   ;;  %v1140_v32 = vld [vmem:[%s1685_s1 + $0x1a4] ss:$8 sps:$4 sm:$0xff]   ;;  %v1181_v33 = vld [vmem:[%s1685_s1 + $0x40] ss:$8 sps:$4 sm:$0xff]  }
   0xc   :  { %676 = vmatprep.subr.bf16.mxu0 %v1119_v6  ;;  %630 = vmatpush1.bf16.msra.mxu1 %v1163_v18  ;;  %v1185_v34 = vld [vmem:[%s1685_s1 + $0x54] ss:$8 sps:$4 sm:$0xff]   ;;  %v1142_v35 = vld [vmem:[%s1685_s1 + $0x1a0] ss:$8 sps:$4 sm:$0xff]   ;;  %v1187_v37 = vld [vmem:[%s1685_s1 + $0x50] ss:$8 sps:$4 sm:$0xff]  }
   0xd   :  { %631 = vmatprep.subr.bf16.mxu1 %v1167_v23  ;;  %v1143_v36 = vld [vmem:[%s1685_s1 + $0x1b4] ss:$8 sps:$4 sm:$0xff]   ;;  %v1191_v38 = vld [vmem:[%s1685_s1 + $0x64] ss:$8 sps:$4 sm:$0xff]   ;;  %v1145_v39 = vld [vmem:[%s1685_s1 + $0x1b0] ss:$8 sps:$4 sm:$0xff]  }
   0xe   :  { %v1146_v40 = vld [vmem:[%s1685_s1 + $0x1c4] ss:$8 sps:$4 sm:$0xff]   ;;  %v1193_v41 = vld [vmem:[%s1685_s1 + $0x60] ss:$8 sps:$4 sm:$0xff]   ;;  %v1197_v42 = vld [vmem:[%s1685_s1 + $0x74] ss:$8 sps:$4 sm:$0xff]  }
   0xf   :  { %677 = vmatpush1.bf16.msra.mxu0 %v1121_v7  ;;  %v1148_v43 = vld [vmem:[%s1685_s1 + $0x1c0] ss:$8 sps:$4 sm:$0xff]   ;;  %v1149_v44 = vld [vmem:[%s1685_s1 + $0x1d4] ss:$8 sps:$4 sm:$0xff]   ;;  %v1199_v45 = vld [vmem:[%s1685_s1 + $0x70] ss:$8 sps:$4 sm:$0xff]  }
  0x10   :  { %678 = vmatprep.subr.bf16.mxu0 %v1122_v8  ;;  %632 = vmatpush1.bf16.msra.mxu1 %v1169_v24  ;;  %v1203_v46 = vld [vmem:[%s1685_s1 + $0x84] ss:$8 sps:$4 sm:$0xff]   ;;  %v1151_v47 = vld [vmem:[%s1685_s1 + $0x1d0] ss:$8 sps:$4 sm:$0xff]   ;;  %v1205_v49 = vld [vmem:[%s1685_s1 + $0x80] ss:$8 sps:$4 sm:$0xff]  }
  0x11   :  { %633 = vmatprep.subr.bf16.mxu1 %v1173_v27  ;;  %v1152_v48 = vld [vmem:[%s1685_s1 + $0x1e4] ss:$8 sps:$4 sm:$0xff]   ;;  %v1209_v50 = vld [vmem:[%s1685_s1 + $0x94] ss:$8 sps:$4 sm:$0xff]   ;;  %v1154_v51 = vld [vmem:[%s1685_s1 + $0x1e0] ss:$8 sps:$4 sm:$0xff]  }
  0x12   :  { %v1158_v52 = vld [vmem:[%s1685_s1 + $0x1f4] ss:$8 sps:$4 sm:$0xff]   ;;  %v1211_v53 = vld [vmem:[%s1685_s1 + $0x90] ss:$8 sps:$4 sm:$0xff]   ;;  %v1215_v54 = vld [vmem:[%s1685_s1 + $0xa4] ss:$8 sps:$4 sm:$0xff]  }
  0x13   :  { %679 = vmatpush1.bf16.msra.mxu0 %v1124_v9  ;;  %v1160_v55 = vld [vmem:[%s1685_s1 + $0x1f0] ss:$8 sps:$4 sm:$0xff]   ;;  %v1166_v56 = vld [vmem:[%s1685_s1 + $0x204] ss:$8 sps:$4 sm:$0xff]   ;;  %v1217_v59 = vld [vmem:[%s1685_s1 + $0xa0] ss:$8 sps:$4 sm:$0xff]  }
  0x14   :  { %680 = vmatprep.subr.bf16.mxu0 %v1125_v10  ;;  %634 = vmatpush1.bf16.msra.mxu1 %v1175_v29  ;;  %v23_v57 = vld [vmem:[%s1686_s0 + $0x10] sm:$0xff]  ;;  %v29_v58 = vld [vmem:[%s1686_s0 + $0x40] sm:$0xff]  ;;  %v22_v2 = vld [vmem:[%s1686_s0 + $0x8] sm:$0xff] }
  0x15   :  { %635 = vmatprep.subr.bf16.mxu1 %v1179_v30  ;;  %v1221_v60 = vld [vmem:[%s1685_s1 + $0xb4] ss:$8 sps:$4 sm:$0xff]   ;;  %v1164_v61 = vld [vmem:[%s1685_s1 + $0x200] ss:$8 sps:$4 sm:$0xff]   ;;  %v35_v62 = vpack.c.bf16 %v29_v58, %v23_v57  ;;  %v1223_v0 = vld [vmem:[%s1685_s1 + $0xb0] ss:$8 sps:$4 sm:$0xff]  }
  0x16   :  { %v1172_v63 = vld [vmem:[%s1685_s1 + $0x214] ss:$8 sps:$4 sm:$0xff]   ;;  %v1227_v1 = vld [vmem:[%s1685_s1 + $0xc4] ss:$8 sps:$4 sm:$0xff]   ;;  %v1170_v5 = vld [vmem:[%s1685_s1 + $0x210] ss:$8 sps:$4 sm:$0xff]  }
  0x17   :  { %681 = vmatpush1.bf16.msra.mxu0 %v1127_v11  ;;  %v28_v3 = vld [vmem:[%s1686_s0 + $0x38] sm:$0xff]  ;;  %v26_v6 = vld [vmem:[%s1686_s0 + $0x28] sm:$0xff]  ;;  %v27_v23 = vld [vmem:[%s1686_s0 + $0x30] sm:$0xff] }
  0x18   :  { %682 = vmatprep.subr.bf16.mxu0 %v1128_v12  ;;  %636 = vmatpush1.bf16.msra.mxu1 %v1181_v33  ;;  %v34_v4 = vpack.c.bf16 %v28_v3, %v22_v2  ;;  %v1178_v7 = vld [vmem:[%s1685_s1 + $0x224] ss:$8 sps:$4 sm:$0xff]   ;;  %v1229_v8 = vld [vmem:[%s1685_s1 + $0xc0] ss:$8 sps:$4 sm:$0xff]   ;;  %v32_v9 = vld [vmem:[%s1686_s0 + $0x58] sm:$0xff] }
  0x19   :  { %637 = vmatprep.subr.bf16.mxu1 %v1185_v34  ;;  %v1233_v10 = vld [vmem:[%s1685_s1 + $0xd4] ss:$8 sps:$4 sm:$0xff]   ;;  %v38_v11 = vpack.c.bf16 %v32_v9, %v26_v6  ;;  %v1176_v12 = vld [vmem:[%s1685_s1 + $0x220] ss:$8 sps:$4 sm:$0xff]   ;;  %v1235_v14 = vld [vmem:[%s1685_s1 + $0xd0] ss:$8 sps:$4 sm:$0xff]   ;;  %v137_v6 = vlaneseq }
  0x1a   :  { %659 = vmatprep.mubr.bf16.mxu1 %v34_v4  ;;  %v1184_v13 = vld [vmem:[%s1685_s1 + $0x234] ss:$8 sps:$4 sm:$0xff]   ;;  %v1190_v17 = vld [vmem:[%s1685_s1 + $0x244] ss:$8 sps:$4 sm:$0xff]   ;;  %v1241_v18 = vld [vmem:[%s1685_s1 + $0xe0] ss:$8 sps:$4 sm:$0xff]  }
  0x1b   :  { %683 = vmatpush1.bf16.msra.mxu0 %v1130_v15  ;;  %v1239_v15 = vld [vmem:[%s1685_s1 + $0xe4] ss:$8 sps:$4 sm:$0xff]   ;;  %v1245_v19 = vld [vmem:[%s1685_s1 + $0xf4] ss:$8 sps:$4 sm:$0xff]   ;;  %v1188_v20 = vld [vmem:[%s1685_s1 + $0x240] ss:$8 sps:$4 sm:$0xff]  }
  0x1c   :  { %684 = vmatprep.subr.bf16.mxu0 %v1131_v16  ;;  %638 = vmatpush1.bf16.msra.mxu1 %v1187_v37  ;;  %v1182_v16 = vld [vmem:[%s1685_s1 + $0x230] ss:$8 sps:$4 sm:$0xff]   ;;  %v1196_v24 = vld [vmem:[%s1685_s1 + $0x254] ss:$8 sps:$4 sm:$0xff]   ;;  %v1202_v29 = vld [vmem:[%s1685_s1 + $0x264] ss:$8 sps:$4 sm:$0xff]  }
  0x1d   :  { %639 = vmatprep.subr.bf16.mxu1 %v1191_v38  ;;  %v1247_v21 = vld [vmem:[%s1685_s1 + $0xf0] ss:$8 sps:$4 sm:$0xff]   ;;  %v1256_v30 = vld [vmem:[%s1687_s3 + $0x48] sm:$0xff]   ;;  %v1208_v33 = vld [vmem:[%s1685_s1 + $0x274] ss:$8 sps:$4 sm:$0xff]  }
  0x1e   :  { %v1194_v27 = vld [vmem:[%s1685_s1 + $0x250] ss:$8 sps:$4 sm:$0xff]   ;;  %v1214_v37 = vld [vmem:[%s1685_s1 + $0x284] ss:$8 sps:$4 sm:$0xff]   ;;  %v135_v9 = vld [vmem:[%s1688_s2] sm:$0x3] }
  0x1f   :  { %685 = vmatpush1.bf16.msra.mxu0 %v1133_v22  ;;  %v21_v22 = vld [vmem:[%s1686_s0] sm:$0xff]  ;;  %v1258_v34 = vld [vmem:[%s1687_s3 + $0x50] sm:$0xff]   ;;  %v1260_v38 = vld [vmem:[%s1687_s3 + $0x58] sm:$0xff]  }
  0x20   :  { %686 = vmatprep.subr.bf16.mxu0 %v1134_v25  ;;  %640 = vmatpush1.bf16.msra.mxu1 %v1193_v41  ;;  %v1254_v25 = vld [vmem:[%s1687_s3 + $0x40] sm:$0xff]   ;;  %v1220_v41 = vld [vmem:[%s1685_s1 + $0x294] ss:$8 sps:$4 sm:$0xff]  }
  0x21   :  { %641 = vmatprep.subr.bf16.mxu1 %v1197_v42  ;;  %v1218_v42 = vld [vmem:[%s1685_s1 + $0x290] ss:$8 sps:$4 sm:$0xff]   ;;  %v1262_v58 = vld [vmem:[%s1687_s3 + $0x60] sm:$0xff]  }
  0x23   :  { %687 = vmatpush1.bf16.msra.mxu0 %v1136_v26  ;;  %v33_v26 = vpack.c.bf16 %v27_v23, %v21_v22 }
  0x24   :  { %688 = vmatprep.subr.bf16.mxu0 %v1137_v28  ;;  %642 = vmatpush1.bf16.msra.mxu1 %v1199_v45  ;;  %v1255_v28 = vld [vmem:[%s1687_s3] sm:$0xff]   ;;  %v1232_v45 = vld [vmem:[%s1685_s1 + $0x2b4] ss:$8 sps:$4 sm:$0xff]  }
  0x25   :  { %643 = vmatprep.subr.bf16.mxu1 %v1203_v46  ;;  %v1230_v46 = vld [vmem:[%s1685_s1 + $0x2b0] ss:$8 sps:$4 sm:$0xff]  }
  0x27   :  { %689 = vmatpush1.bf16.msra.mxu0 %v1139_v31  ;;  %v1200_v31 = vld [vmem:[%s1685_s1 + $0x260] ss:$8 sps:$4 sm:$0xff]  }
  0x28   :  { %690 = vmatprep.subr.bf16.mxu0 %v1140_v32  ;;  %644 = vmatpush1.bf16.msra.mxu1 %v1205_v49  ;;  %v1257_v32 = vld [vmem:[%s1687_s3 + $0x8] sm:$0xff]   ;;  %v1244_v49 = vld [vmem:[%s1685_s1 + $0x2d4] ss:$8 sps:$4 sm:$0xff]  }
  0x29   :  { %645 = vmatprep.subr.bf16.mxu1 %v1209_v50  ;;  %v1242_v50 = vld [vmem:[%s1685_s1 + $0x2d0] ss:$8 sps:$4 sm:$0xff]  }
  0x2b   :  { %691 = vmatpush1.bf16.msra.mxu0 %v1142_v35  ;;  %v1206_v35 = vld [vmem:[%s1685_s1 + $0x270] ss:$8 sps:$4 sm:$0xff]  }
  0x2c   :  { %692 = vmatprep.subr.bf16.mxu0 %v1143_v36  ;;  %646 = vmatpush1.bf16.msra.mxu1 %v1211_v53  ;;  %v1259_v36 = vld [vmem:[%s1687_s3 + $0x10] sm:$0xff]  }
  0x2d   :  { %647 = vmatprep.subr.bf16.mxu1 %v1215_v54  ;;  %v1253_v53 = vld [vmem:[%s1685_s1 + $0x2f4] ss:$8 sps:$4 sm:$0xff]   ;;  %v1251_v54 = vld [vmem:[%s1685_s1 + $0x2f0] ss:$8 sps:$4 sm:$0xff]  }
  0x2f   :  { %693 = vmatpush1.bf16.msra.mxu0 %v1145_v39  ;;  %v1212_v39 = vld [vmem:[%s1685_s1 + $0x280] ss:$8 sps:$4 sm:$0xff]  }
  0x30   :  { %694 = vmatprep.subr.bf16.mxu0 %v1146_v40  ;;  %648 = vmatpush1.bf16.msra.mxu1 %v1217_v59  ;;  %v1261_v40 = vld [vmem:[%s1687_s3 + $0x18] sm:$0xff]   ;;  %v1263_v59 = vld [vmem:[%s1687_s3 + $0x20] sm:$0xff]  }
  0x31   :  { %649 = vmatprep.subr.bf16.mxu1 %v1221_v60  ;;  %v1264_v60 = vld [vmem:[%s1687_s3 + $0x68] sm:$0xff]  }
  0x33   :  { %695 = vmatpush1.bf16.msra.mxu0 %v1148_v43  ;;  %v1226_v43 = vld [vmem:[%s1685_s1 + $0x2a4] ss:$8 sps:$4 sm:$0xff]  }
  0x34   :  { %696 = vmatprep.subr.bf16.mxu0 %v1149_v44  ;;  %650 = vmatpush1.bf16.msra.mxu1 %v1223_v0  ;;  %v1224_v44 = vld [vmem:[%s1685_s1 + $0x2a0] ss:$8 sps:$4 sm:$0xff]   ;;  %v1268_v0 = vld [vmem:[%s1687_s3 + $0x78] sm:$0xff]  }
  0x35   :  { %651 = vmatprep.subr.bf16.mxu1 %v1227_v1  ;;  %v1269_v1 = vld [vmem:[%s1687_s3 + $0x38] sm:$0xff]  }
  0x37   :  { %697 = vmatpush1.bf16.msra.mxu0 %v1151_v47  ;;  %v1238_v47 = vld [vmem:[%s1685_s1 + $0x2c4] ss:$8 sps:$4 sm:$0xff]  }
  0x38   :  { %698 = vmatprep.subr.bf16.mxu0 %v1152_v48  ;;  %652 = vmatpush1.bf16.msra.mxu1 %v1229_v8  ;;  %v1236_v48 = vld [vmem:[%s1685_s1 + $0x2c0] ss:$8 sps:$4 sm:$0xff]  }
  0x39   :  { %653 = vmatprep.subr.bf16.mxu1 %v1233_v10 }
  0x3b   :  { %699 = vmatpush1.bf16.msra.mxu0 %v1154_v51  ;;  %v1250_v51 = vld [vmem:[%s1685_s1 + $0x2e4] ss:$8 sps:$4 sm:$0xff]  }
  0x3c   :  { %700 = vmatprep.subr.bf16.mxu0 %v1158_v52  ;;  %654 = vmatpush1.bf16.msra.mxu1 %v1235_v14  ;;  %v1248_v52 = vld [vmem:[%s1685_s1 + $0x2e0] ss:$8 sps:$4 sm:$0xff]  }
  0x3d   :  { %655 = vmatprep.subr.bf16.mxu1 %v1239_v15 }
  0x3f   :  { %701 = vmatpush1.bf16.msra.mxu0 %v1160_v55  ;;  %v25_v55 = vld [vmem:[%s1686_s0 + $0x20] sm:$0xff] }
  0x40   :  { %713 = vmatprep.subr.bf16.mxu0 %v1166_v56  ;;  %656 = vmatpush1.bf16.msra.mxu1 %v1241_v18  ;;  %v31_v56 = vld [vmem:[%s1686_s0 + $0x50] sm:$0xff] }
  0x41   :  { %657 = vmatprep.subr.bf16.mxu1 %v1245_v19  ;;  %v37_v57 = vpack.c.bf16 %v31_v56, %v25_v55 }
  0x42   :  { %703 = vmatmul.mubr.bf16.vlgmr.msra.gmra.mrb[0].mxu0 %v35_v62  ;;  %v1266_v62 = vld [vmem:[%s1687_s3 + $0x70] sm:$0xff]  }
  0x43   :  { %714 = vmatpush1.bf16.msra.mxu0 %v1164_v61  ;;  %745 = vmatprep.mubr.bf16.mxu0 %v38_v11  ;;  %v1265_v61 = vld [vmem:[%s1687_s3 + $0x28] sm:$0xff]  }
  0x44   :  { %715 = vmatprep.subr.bf16.mxu0 %v1172_v63  ;;  %658 = vmatpush1.bf16.msra.mxu1 %v1247_v21  ;;  %v1267_v63 = vld [vmem:[%s1687_s3 + $0x30] sm:$0xff]  }
  0x45   :  { %1076 = vmatprep.subr.bf16.mxu1 %v1254_v25 }
  0x47   :  { %716 = vmatpush1.bf16.msra.mxu0 %v1170_v5  ;;  %660 = vmatmul.mubr.bf16.vlgmr.msra.gmra.mrb[0].mxu1 %v33_v26 }
  0x48   :  { %717 = vmatprep.subr.bf16.mxu0 %v1178_v7  ;;  %1077 = vmatpush3.bf16.msra.mxu1 %v1255_v28  ;;  %v138_v7 = vshrl.u32 %v137_v6, 7 }
  0x49   :  { %1078 = vmatprep.subr.bf16.mxu1 %v1256_v30 }
  0x4a   :  { %v139_v8 = vsub.s32 0, %v138_v7  ;;  %v143_v10 = vsub.s32 1, %v138_v7 }
  0x4b   :  { %718 = vmatpush1.bf16.msra.mxu0 %v1176_v12 }
  0x4c   :  { %719 = vmatprep.subr.bf16.mxu0 %v1184_v13  ;;  %1079 = vmatpush3.bf16.msra.mxu1 %v1257_v32  ;;  %v140_v11 = vrot.slane %v135_v9, %v139_v8  ;;  %v144_v12 = vrot.slane %v135_v9, %v143_v10  ;;  %v1050_v32 = vld [vmem:[%s1689_s4] ss:$0 sm:$0xff] }
  0x4d   :  { %1080 = vmatprep.subr.bf16.mxu1 %v1258_v34 }
  0x4f   :  { %720 = vmatpush1.bf16.msra.mxu0 %v1182_v16 }
  0x50   :  { %721 = vmatprep.subr.bf16.mxu0 %v1190_v17  ;;  %1081 = vmatpush3.bf16.msra.mxu1 %v1259_v36 }
  0x51   :  { %1082 = vmatprep.subr.bf16.mxu1 %v1260_v38 }
  0x53   :  { %722 = vmatpush1.bf16.msra.mxu0 %v1188_v20 }
  0x54   :  { %723 = vmatprep.subr.bf16.mxu0 %v1196_v24  ;;  %1083 = vmatpush3.bf16.msra.mxu1 %v1261_v40 }
  0x55   :  { %1084 = vmatprep.subr.bf16.mxu1 %v1262_v58 }
  0x57   :  { %724 = vmatpush1.bf16.msra.mxu0 %v1194_v27 }
  0x58   :  { %725 = vmatprep.subr.bf16.mxu0 %v1202_v29  ;;  %1085 = vmatpush3.bf16.msra.mxu1 %v1263_v59 }
  0x59   :  { %1086 = vmatprep.subr.bf16.mxu1 %v1264_v60 }
  0x5b   :  { %726 = vmatpush1.bf16.msra.mxu0 %v1200_v31 }
  0x5c   :  { %727 = vmatprep.subr.bf16.mxu0 %v1208_v33  ;;  %1087 = vmatpush3.bf16.msra.mxu1 %v1265_v61 }
  0x5d   :  { %1088 = vmatprep.subr.bf16.mxu1 %v1266_v62 }
  0x5f   :  { %728 = vmatpush1.bf16.msra.mxu0 %v1206_v35 }
  0x60   :  { %729 = vmatprep.subr.bf16.mxu0 %v1214_v37  ;;  %1089 = vmatpush3.bf16.msra.mxu1 %v1267_v63 }
  0x61   :  { %1090 = vmatprep.subr.bf16.mxu1 %v1268_v0 }
  0x63   :  { %730 = vmatpush1.bf16.msra.mxu0 %v1212_v39 }
  0x64   :  { %731 = vmatprep.subr.bf16.mxu0 %v1220_v41  ;;  %1091 = vmatpush3.bf16.msra.mxu1 %v1269_v1 }
  0x67   :  { %732 = vmatpush1.bf16.msra.mxu0 %v1218_v42 }
  0x68   :  { %733 = vmatprep.subr.bf16.mxu0 %v1226_v43 }
  0x6b   :  { %734 = vmatpush1.bf16.msra.mxu0 %v1224_v44 }
  0x6c   :  { %735 = vmatprep.subr.bf16.mxu0 %v1232_v45 }
  0x6f   :  { %736 = vmatpush1.bf16.msra.mxu0 %v1230_v46 }
  0x70   :  { %737 = vmatprep.subr.bf16.mxu0 %v1238_v47 }
  0x73   :  { %738 = vmatpush1.bf16.msra.mxu0 %v1236_v48 }
  0x74   :  { %739 = vmatprep.subr.bf16.mxu0 %v1244_v49 }
  0x77   :  { %740 = vmatpush1.bf16.msra.mxu0 %v1242_v50 }
  0x78   :  { %741 = vmatprep.subr.bf16.mxu0 %v1250_v51 }
  0x7b   :  { %742 = vmatpush1.bf16.msra.mxu0 %v1248_v52 }
  0x7c   :  { %743 = vmatprep.subr.bf16.mxu0 %v1253_v53 }
  0x7f   :  { %744 = vmatpush1.bf16.msra.mxu0 %v1251_v54 }
  0x82   :  { %746 = vmatmul.mubr.bf16.vlgmr.msra.gmra.mrb[0].mxu0 %v37_v57 }
 0x11a   :  { %v661_v2 = vpop.f32.mrb[0].mxu1 }
 0x11b   :  { %v663_v3 = vpop.f32.mrb[1].mxu1  ;;  %v662_v13 = vadd.f32 %v661_v2, %v140_v11 }
 0x11c   :  { %v665_v4 = vpop.f32.mrb[2].mxu1  ;;  %v664_v14 = vadd.f32 %v663_v3, %v144_v12 }
 0x11d   :  { %v667_v5 = vpop.f32.mrb[3].mxu1  ;;  %v666_v16 = vadd.f32 %v665_v4, %v140_v11 }
 0x11e   :  { %v668_v19 = vadd.f32 %v667_v5, %v144_v12 }
 0x155   :  { %v747_v15 = vpop.f32.mrb[0].mxu0 }
 0x156   :  { %v1099_v17 = vadd.f32 %v747_v15, %v662_v13  ;;  %v749_v18 = vpop.f32.mrb[1].mxu0 }
 0x157   :  { %v1101_v20 = vadd.f32 %v749_v18, %v664_v14  ;;  %v751_v21 = vpop.f32.mrb[2].mxu0 }
 0x158   :  { %v1103_v22 = vadd.f32 %v751_v21, %v666_v16  ;;  %v753_v23 = vpop.f32.mrb[3].mxu0  ;;  %v756_v25 = vmax.f32 %v1099_v17, 0.0 }
 0x159   :  { %v1105_v24 = vadd.f32 %v753_v23, %v668_v19  ;;  %v757_v27 = vmax.f32 %v1101_v20, 0.0 }
 0x15a   :  { %v758_v26 = vmax.f32 %v1103_v22, 0.0 }
 0x15b   :  { %v759_v28 = vmax.f32 %v1105_v24, 0.0 }
 0x15c   :  { %v760_v29 = vpack.c.bf16 %v758_v26, %v756_v25 }
 0x15d   :  { %v761_v30 = vpack.c.bf16 %v759_v28, %v757_v27 }
 0x15f   :  { %929 = vmatprep.mubr.bf16.mxu1 %v761_v30 }
 0x160   :  { %930 = vmatmul.mubr.bf16.vlgmr.msra.gmra.mrb[4].mxu1 %v760_v29 }
 0x233   :  { %v1092_v31 = vpop.f32.mrb[4].mxu1 }
 0x234   :  { %v1093_v33 = vpop.f32.mrb[5].mxu1 }
 0x235   :  { %v1094_v34 = vadd.f32 %v1093_v33, %v1092_v31  ;;  %v1095_v35 = vpop.f32.mrb[6].mxu1 }
 0x236   :  { %v1096_v36 = vpop.f32.mrb[7].mxu1 }
 0x237   :  { %v932_v37 = vadd.f32 %v1094_v34, %v1050_v32  ;;  %v1097_v38 = vadd.f32 %v1096_v36, %v1095_v35 }
 0x239   :  { %v935_v39 = vadd.f32 %v1097_v38, %v1050_v32  ;;  %1270 = vtanh.f32 %v932_v37 }
 0x23b   :  { %1272 = vtanh.f32 %v935_v39 }
 0x243   :  { %v1271_v40 = vpop.eup %1270 }
 0x245   :  { %v1273_v41 = vpop.eup %1272 }
 0x246   :  { %v1074_v42 = vpack.c.bf16 %v1273_v41, %v1271_v40 }
 0x248   :  { %1075 = vst [vmem:[%s1690_s5] sm:$0xff] %v1074_v42  }

</bundles_post_ra>
